<compile_context>
chip_gen: v6e
topology: v6e:2x2x1
jax: 0.10.0
libtpu: 0.0.40
codegen_flags: <defaults>
</compile_context>

<pallas_src>
import jax
import jax.numpy as jnp
from jax.experimental import pallas as pl
from jax.experimental.pallas import tpu as pltpu


def _scale_mul_kernel(x_ref, s_ref, o_ref):
    # x_ref: (block_rows, HW) activation tile
    # s_ref: (block_rows, 1)  per-row scale tile (same block index as x)
    o_ref[...] = x_ref[...] * s_ref[...]   # VPU broadcast multiply


def _sublane_multiple(dtype):
    # Sublane packing requirement per element width (f32: 8, bf16: 16, i8: 32).
    itemsize = jnp.dtype(dtype).itemsize
    return max(8, 32 // itemsize)


def channel_scale_mul(x_nchw, s_nc11, *, block_rows=600):
    """x_nchw: (N, C, H, W), s_nc11: (N, C, 1, 1); returns x * s (NCHW)."""
    N, C, H, W = x_nchw.shape
    assert s_nc11.shape == (N, C, 1, 1), "scale must be (N, C, 1, 1)"
    R = N * C          # rows: one per (batch, channel)
    HW = H * W         # lane axis: full spatial extent

    sub = _sublane_multiple(x_nchw.dtype)
    if R % block_rows != 0 or block_rows % sub != 0 or block_rows > R:
        # Full-extent block is always a legal block shape and fits VMEM here.
        block_rows = R

    x2d = x_nchw.reshape(R, HW)
    s2d = s_nc11.reshape(R, 1)

    grid = (R // block_rows,)
    out2d = pl.pallas_call(
        _scale_mul_kernel,
        out_shape=jax.ShapeDtypeStruct((R, HW), x_nchw.dtype),
        grid=grid,
        in_specs=[
            # activation: one row block per grid step, full HW on lanes
            pl.BlockSpec((block_rows, HW), lambda i: (i, 0)),
            # per-row scale: matching row block, tiny (2.4 KB) DMA per step
            pl.BlockSpec((block_rows, 1), lambda i: (i, 0)),
        ],
        out_specs=pl.BlockSpec((block_rows, HW), lambda i: (i, 0)),
        compiler_params=pltpu.CompilerParams(
            # independent row blocks -> shard across v7x's two TensorCores
            dimension_semantics=("parallel",),
        ),
    )(x2d, s2d)

    return out2d.reshape(N, C, H, W)


if __name__ == "__main__":
    key = jax.random.PRNGKey(0)
    k1, k2 = jax.random.split(key)
    # Shapes exactly as in the reference module (already modest: ~940 KB).
    x418 = jax.random.normal(k1, (1, 1200, 14, 14), dtype=jnp.float32)
    x423 = jax.random.normal(k2, (1, 1200, 1, 1), dtype=jnp.float32)

    out = channel_scale_mul(x418, x423)
    out = jax.block_until_ready(out)

    # Correctness check against plain-JAX broadcasting semantics.
    ref = x418 * x423
    assert out.shape == (1, 1200, 14, 14)
    assert out.dtype == ref.dtype
    assert jnp.allclose(out, ref, atol=1e-6, rtol=1e-6)
    print("KERNEL_OK")
</pallas_src>

<mosaic_0001>
module attributes {stable_mosaic.version = 11 : i64} {
  func.func @_scale_mul_kernel(%arg0: i32, %arg1: memref<600x196xf32, #tpu.memory_space<vmem>>, %arg2: memref<600x1xf32, #tpu.memory_space<vmem>>, %arg3: memref<600x196xf32, #tpu.memory_space<vmem>>) attributes {dimension_semantics = [#tpu.dimension_semantics<parallel>], iteration_bounds = array<i64: 2>, scalar_prefetch = 0 : i64, scratch_operands = 0 : i64, tpu.core_type = #tpu.core_type<tc>, window_params = [{transform_indices = @transform_0, window_bounds = array<i64: 600, 196>}, {transform_indices = @transform_1, window_bounds = array<i64: 600, 1>}, {transform_indices = @transform_2, window_bounds = array<i64: 600, 196>}]} {
    %c0 = arith.constant 0 : index
    %c0_0 = arith.constant 0 : index
    %0 = vector.load %arg1[%c0, %c0_0] : memref<600x196xf32, #tpu.memory_space<vmem>>, vector<600x196xf32>
    %c0_1 = arith.constant 0 : index
    %c0_2 = arith.constant 0 : index
    %1 = vector.load %arg2[%c0_1, %c0_2] : memref<600x1xf32, #tpu.memory_space<vmem>>, vector<600x1xf32>
    %2 = vector.broadcast %1 : vector<600x1xf32> to vector<600x196xf32>
    %3 = arith.mulf %0, %2 : vector<600x196xf32>
    %c0_3 = arith.constant 0 : index
    %c0_4 = arith.constant 0 : index
    %4 = vector.load %arg3[%c0_3, %c0_4] : memref<600x196xf32, #tpu.memory_space<vmem>>, vector<600x196xf32>
    tpu.vector_store %arg3[%c0_3, %c0_4], %3 {strides = array<i32>} : memref<600x196xf32, #tpu.memory_space<vmem>>, vector<600x196xf32>,
    return
  }
  func.func @transform_0(%arg0: i32) -> (i32, i32) {
    %c0_i32 = arith.constant 0 : i32
    %c0_i32_0 = arith.constant 0 : i32
    return %arg0, %c0_i32 : i32, i32
  }
  func.func @transform_1(%arg0: i32) -> (i32, i32) {
    %c0_i32 = arith.constant 0 : i32
    %c0_i32_0 = arith.constant 0 : i32
    return %arg0, %c0_i32 : i32, i32
  }
  func.func @transform_2(%arg0: i32) -> (i32, i32) {
    %c0_i32 = arith.constant 0 : i32
    %c0_i32_0 = arith.constant 0 : i32
    return %arg0, %c0_i32 : i32, i32
  }
}

</mosaic_0001>

<bundles_post_ra>
// kernel: tpu_custom_call.1
= control target key start
LH: loop header
LB: loop body
LE: loop exit
PB: predicated region body
PF: predicated region fallthrough
CT: control target
= control target key end

     0   :  { %s1194_s9 = smov 0   ;;  %s1674_s0 = inlined_call_operand.vmem [shape: f32[1200,196], index: 0, kind: input, shape index: {}]   ;;  %s1675_s1 = inlined_call_operand.vmem [shape: f32[1200,1], index: 1, kind: input, shape index: {}]   ;;  %s1676_s2 = inlined_call_operand.vmem [shape: f32[1200,196], index: 2, kind: output, shape index: {}]  }
   0x1 LB: > { %s1145_s10 = sadd.s32 4294967295, %s1176_s9   ;;  %p1149_p0 = scmp.ge.s32.totalorder %s1176_s9, 1  ;;  %s1176_s9 = sphi %s1194_s9, %s12_s9  }
   0x2   : > { %p125_p1 = scmp.lt.s32.totalorder %s1176_s9, 3 }
   0x4   : > { %p126_p2 = pnand %p1149_p0, %p125_p1 }
   0x5   : > { %s154_s11 = smul.u32 (!%p126_p2), 75, %s1145_s10 }
   0x6   : > { %129 = sbr.rel (%p126_p2) target bundleno = 291 (0x123), region = 28 }
   0x7   : > { %p155_p3 = scmp.lt.s32.totalorder (!%p126_p2), %s154_s11, 149 }
   0xb   : > { %v1178_v0 = vmov 0   ;;  %s1678_s11 = smov (!%p155_p3, %s154_s11), 149  ;;  %vm925_vm0 = vcmask 556032  }
   0xc   : > { %1169 = vset.pattern.permute.xlu1 %v1178_v0  ;;  %1168 = vset.pattern.permute.xlu0 %v1178_v0  ;;  %s1152_s12 = sshll.u32 %s1678_s11, 3  ;;  %s1157_s16 = sshll.u32 %s1678_s11, 4 }
   0xd   : > { %s1208_s15 = scalar_lea.vmem %s1675_s1, %s1152_s12  ;;  %s1276_s19 = scalar_lea.vmem %s1674_s0, %s1157_s16 }
   0xe   : > { %v326_v1 = vld [vmem:[%s1208_s15 + $0x10] sm:$0xff]  ;;  %v324_v2 = vld [vmem:[%s1208_s15] sm:$0xff]  ;;  %v327_v3 = vld [vmem:[%s1208_s15 + $0x18] sm:$0xff]  ;;  %s1287_s22 = scalar_lea.vmem %s1676_s2, %s1157_s16 }
   0xf   : > { %411 = vperm.xlu1 %1169, %v326_v1   ;;  %401 = vperm.xlu0 %1168, %v324_v2   ;;  %v325_v4 = vld [vmem:[%s1208_s15 + $0x8] sm:$0xff]  ;;  %v328_v6 = vld [vmem:[%s1208_s15 + $0x20] sm:$0xff]  ;;  %v331_v7 = vld [vmem:[%s1208_s15 + $0x38] sm:$0xff] }
  0x10   : > { %v329_v5 = vld [vmem:[%s1208_s15 + $0x28] sm:$0xff]  ;;  %v330_v8 = vld [vmem:[%s1208_s15 + $0x30] sm:$0xff]  ;;  %v332_v10 = vld [vmem:[%s1208_s15 + $0x40] sm:$0xff] }
  0x11   : > { %v333_v9 = vld [vmem:[%s1208_s15 + $0x48] sm:$0xff]  ;;  %v335_v11 = vld [vmem:[%s1208_s15 + $0x58] sm:$0xff]  ;;  %v334_v12 = vld [vmem:[%s1208_s15 + $0x50] sm:$0xff] }
  0x12   : > { %v337_v13 = vld [vmem:[%s1208_s15 + $0x68] sm:$0xff]  ;;  %v336_v14 = vld [vmem:[%s1208_s15 + $0x60] sm:$0xff]  ;;  %v339_v15 = vld [vmem:[%s1208_s15 + $0x78] sm:$0xff] }
  0x13   : > { %416 = vperm.xlu1 %1169, %v327_v3   ;;  %406 = vperm.xlu0 %1168, %v325_v4   ;;  %v338_v16 = vld [vmem:[%s1208_s15 + $0x70] sm:$0xff]  ;;  %v341_v17 = vld [vmem:[%s1208_s15 + $0x88] sm:$0xff]  ;;  %v340_v18 = vld [vmem:[%s1208_s15 + $0x80] sm:$0xff] }
  0x14   : > { %v343_v19 = vld [vmem:[%s1208_s15 + $0x98] sm:$0xff]  ;;  %v342_v20 = vld [vmem:[%s1208_s15 + $0x90] sm:$0xff]  ;;  %v345_v21 = vld [vmem:[%s1208_s15 + $0xa8] sm:$0xff] }
  0x15   : > { %v344_v22 = vld [vmem:[%s1208_s15 + $0xa0] sm:$0xff]  ;;  %v347_v23 = vld [vmem:[%s1208_s15 + $0xb8] sm:$0xff]  ;;  %v346_v24 = vld [vmem:[%s1208_s15 + $0xb0] sm:$0xff] }
  0x16   : > { %v349_v25 = vld [vmem:[%s1208_s15 + $0xc8] sm:$0xff]  ;;  %v348_v26 = vld [vmem:[%s1208_s15 + $0xc0] sm:$0xff]  ;;  %v351_v27 = vld [vmem:[%s1208_s15 + $0xd8] sm:$0xff] }
  0x17   : > { %426 = vperm.xlu1 %1169, %v329_v5   ;;  %421 = vperm.xlu0 %1168, %v328_v6   ;;  %v350_v28 = vld [vmem:[%s1208_s15 + $0xd0] sm:$0xff]  ;;  %v353_v29 = vld [vmem:[%s1208_s15 + $0xe8] sm:$0xff]  ;;  %v352_v30 = vld [vmem:[%s1208_s15 + $0xe0] sm:$0xff] }
  0x18   : > { %v355_v31 = vld [vmem:[%s1208_s15 + $0xf8] sm:$0xff]  ;;  %v354_v32 = vld [vmem:[%s1208_s15 + $0xf0] sm:$0xff]  ;;  %v357_v33 = vld [vmem:[%s1208_s15 + $0x108] sm:$0xff] }
  0x19   : > { %v356_v34 = vld [vmem:[%s1208_s15 + $0x100] sm:$0xff]  ;;  %v359_v35 = vld [vmem:[%s1208_s15 + $0x118] sm:$0xff]  ;;  %v358_v36 = vld [vmem:[%s1208_s15 + $0x110] sm:$0xff] }
  0x1a   : > { %v361_v37 = vld [vmem:[%s1208_s15 + $0x128] sm:$0xff]  ;;  %v360_v38 = vld [vmem:[%s1208_s15 + $0x120] sm:$0xff]  ;;  %v363_v39 = vld [vmem:[%s1208_s15 + $0x138] sm:$0xff] }
  0x1b   : > { %436 = vperm.xlu1 %1169, %v331_v7   ;;  %431 = vperm.xlu0 %1168, %v330_v8   ;;  %v362_v40 = vld [vmem:[%s1208_s15 + $0x130] sm:$0xff]  ;;  %v365_v41 = vld [vmem:[%s1208_s15 + $0x148] sm:$0xff]  ;;  %v364_v42 = vld [vmem:[%s1208_s15 + $0x140] sm:$0xff] }
  0x1c   : > { %v367_v43 = vld [vmem:[%s1208_s15 + $0x158] sm:$0xff]  ;;  %v366_v44 = vld [vmem:[%s1208_s15 + $0x150] sm:$0xff]  ;;  %v369_v45 = vld [vmem:[%s1208_s15 + $0x168] sm:$0xff] }
  0x1d   : > { %v368_v46 = vld [vmem:[%s1208_s15 + $0x160] sm:$0xff]  ;;  %v371_v47 = vld [vmem:[%s1208_s15 + $0x178] sm:$0xff]  ;;  %v370_v48 = vld [vmem:[%s1208_s15 + $0x170] sm:$0xff] }
  0x1e   : > { %v373_v49 = vld [vmem:[%s1208_s15 + $0x188] sm:$0xff]  ;;  %v372_v50 = vld [vmem:[%s1208_s15 + $0x180] sm:$0xff]  ;;  %v375_v51 = vld [vmem:[%s1208_s15 + $0x198] sm:$0xff] }
  0x1f   : > { %446 = vperm.xlu1 %1169, %v333_v9   ;;  %441 = vperm.xlu0 %1168, %v332_v10   ;;  %v374_v52 = vld [vmem:[%s1208_s15 + $0x190] sm:$0xff]  ;;  %v377_v53 = vld [vmem:[%s1208_s15 + $0x1a8] sm:$0xff]  ;;  %v376_v54 = vld [vmem:[%s1208_s15 + $0x1a0] sm:$0xff] }
  0x20   : > { %v379_v55 = vld [vmem:[%s1208_s15 + $0x1b8] sm:$0xff]  ;;  %v378_v56 = vld [vmem:[%s1208_s15 + $0x1b0] sm:$0xff]  ;;  %v381_v57 = vld [vmem:[%s1208_s15 + $0x1c8] sm:$0xff] }
  0x21   : > { %v380_v58 = vld [vmem:[%s1208_s15 + $0x1c0] sm:$0xff]  ;;  %v383_v59 = vld [vmem:[%s1208_s15 + $0x1d8] sm:$0xff]  ;;  %v382_v60 = vld [vmem:[%s1208_s15 + $0x1d0] sm:$0xff] }
  0x22   : > { %v385_v61 = vld [vmem:[%s1208_s15 + $0x1e8] sm:$0xff]  ;;  %v384_v62 = vld [vmem:[%s1208_s15 + $0x1e0] sm:$0xff]  ;;  %v387_v3 = vld [vmem:[%s1208_s15 + $0x1f8] sm:$0xff] }
  0x23   : > { %456 = vperm.xlu1 %1169, %v335_v11   ;;  %451 = vperm.xlu0 %1168, %v334_v12   ;;  %v178_v63 = vld [vmem:[%s1276_s19 + $0x20] sm:$0xff]  ;;  %v179_v0 = vld [vmem:[%s1276_s19 + $0x28] sm:$0xff]  ;;  %v386_v4 = vld [vmem:[%s1208_s15 + $0x1f0] sm:$0xff] }
  0x24   : > { %v174_v1 = vld [vmem:[%s1276_s19] sm:$0xff]  ;;  %v175_v2 = vld [vmem:[%s1276_s19 + $0x8] sm:$0xff]  ;;  %v180_v11 = vld [vmem:[%s1276_s19 + $0x30] sm:$0xff] }
  0x25   : > { %v181_v12 = vld [vmem:[%s1276_s19 + $0x38] sm:$0xff] }
  0x27   : > { %466 = vperm.xlu1 %1169, %v337_v13   ;;  %461 = vperm.xlu0 %1168, %v336_v14   ;;  %v176_v13 = vld [vmem:[%s1276_s19 + $0x10] sm:$0xff]  ;;  %v177_v14 = vld [vmem:[%s1276_s19 + $0x18] sm:$0xff] }
  0x2b   : > { %476 = vperm.xlu1 %1169, %v339_v15   ;;  %471 = vperm.xlu0 %1168, %v338_v16   ;;  %v389_v15 = vld [vmem:[%s1208_s15 + $0x208] sm:$0xff]  ;;  %v388_v16 = vld [vmem:[%s1208_s15 + $0x200] sm:$0xff] }
  0x2f   : > { %486 = vperm.xlu1 %1169, %v341_v17   ;;  %481 = vperm.xlu0 %1168, %v340_v18  }
  0x33   : > { %496 = vperm.xlu1 %1169, %v343_v19   ;;  %491 = vperm.xlu0 %1168, %v342_v20  }
  0x37   : > { %506 = vperm.xlu1 %1169, %v345_v21   ;;  %501 = vperm.xlu0 %1168, %v344_v22  }
  0x3b   : > { %516 = vperm.xlu1 %1169, %v347_v23   ;;  %511 = vperm.xlu0 %1168, %v346_v24   ;;  %v184_v23 = vld [vmem:[%s1276_s19 + $0x50] sm:$0xff]  ;;  %v185_v24 = vld [vmem:[%s1276_s19 + $0x58] sm:$0xff] }
  0x3f   : > { %526 = vperm.xlu1 %1169, %v349_v25   ;;  %521 = vperm.xlu0 %1168, %v348_v26   ;;  %v182_v25 = vld [vmem:[%s1276_s19 + $0x40] sm:$0xff]  ;;  %v183_v26 = vld [vmem:[%s1276_s19 + $0x48] sm:$0xff] }
  0x43   : > { %536 = vperm.xlu1 %1169, %v351_v27   ;;  %531 = vperm.xlu0 %1168, %v350_v28   ;;  %v391_v27 = vld [vmem:[%s1208_s15 + $0x218] sm:$0xff]  ;;  %v390_v28 = vld [vmem:[%s1208_s15 + $0x210] sm:$0xff] }
  0x47   : > { %546 = vperm.xlu1 %1169, %v353_v29   ;;  %541 = vperm.xlu0 %1168, %v352_v30  }
  0x4b   : > { %556 = vperm.xlu1 %1169, %v355_v31   ;;  %551 = vperm.xlu0 %1168, %v354_v32  }
  0x4f   : > { %566 = vperm.xlu1 %1169, %v357_v33   ;;  %561 = vperm.xlu0 %1168, %v356_v34  }
  0x53   : > { %576 = vperm.xlu1 %1169, %v359_v35   ;;  %571 = vperm.xlu0 %1168, %v358_v36   ;;  %v188_v35 = vld [vmem:[%s1276_s19 + $0x70] sm:$0xff]  ;;  %v189_v36 = vld [vmem:[%s1276_s19 + $0x78] sm:$0xff] }
  0x57   : > { %586 = vperm.xlu1 %1169, %v361_v37   ;;  %581 = vperm.xlu0 %1168, %v360_v38   ;;  %v186_v37 = vld [vmem:[%s1276_s19 + $0x60] sm:$0xff]  ;;  %v187_v38 = vld [vmem:[%s1276_s19 + $0x68] sm:$0xff] }
  0x5b   : > { %596 = vperm.xlu1 %1169, %v363_v39   ;;  %591 = vperm.xlu0 %1168, %v362_v40   ;;  %v393_v39 = vld [vmem:[%s1208_s15 + $0x228] sm:$0xff]  ;;  %v392_v40 = vld [vmem:[%s1208_s15 + $0x220] sm:$0xff] }
  0x5f   : > { %606 = vperm.xlu1 %1169, %v365_v41   ;;  %601 = vperm.xlu0 %1168, %v364_v42  }
  0x63   : > { %616 = vperm.xlu1 %1169, %v367_v43   ;;  %611 = vperm.xlu0 %1168, %v366_v44  }
  0x67   : > { %626 = vperm.xlu1 %1169, %v369_v45   ;;  %621 = vperm.xlu0 %1168, %v368_v46  }
  0x6b   : > { %636 = vperm.xlu1 %1169, %v371_v47   ;;  %631 = vperm.xlu0 %1168, %v370_v48   ;;  %v192_v47 = vld [vmem:[%s1276_s19 + $0x90] sm:$0xff]  ;;  %v193_v48 = vld [vmem:[%s1276_s19 + $0x98] sm:$0xff] }
  0x6f   : > { %646 = vperm.xlu1 %1169, %v373_v49   ;;  %641 = vperm.xlu0 %1168, %v372_v50   ;;  %v190_v49 = vld [vmem:[%s1276_s19 + $0x80] sm:$0xff]  ;;  %v191_v50 = vld [vmem:[%s1276_s19 + $0x88] sm:$0xff] }
  0x73   : > { %656 = vperm.xlu1 %1169, %v375_v51   ;;  %651 = vperm.xlu0 %1168, %v374_v52   ;;  %v395_v51 = vld [vmem:[%s1208_s15 + $0x238] sm:$0xff]  ;;  %v394_v52 = vld [vmem:[%s1208_s15 + $0x230] sm:$0xff] }
  0x77   : > { %666 = vperm.xlu1 %1169, %v377_v53   ;;  %661 = vperm.xlu0 %1168, %v376_v54  }
  0x7b   : > { %676 = vperm.xlu1 %1169, %v379_v55   ;;  %671 = vperm.xlu0 %1168, %v378_v56  }
  0x7f   : > { %686 = vperm.xlu1 %1169, %v381_v57   ;;  %681 = vperm.xlu0 %1168, %v380_v58  }
  0x83   : > { %696 = vperm.xlu1 %1169, %v383_v59   ;;  %691 = vperm.xlu0 %1168, %v382_v60   ;;  %v196_v59 = vld [vmem:[%s1276_s19 + $0xb0] sm:$0xff]  ;;  %v197_v60 = vld [vmem:[%s1276_s19 + $0xb8] sm:$0xff] }
  0x87   : > { %706 = vperm.xlu1 %1169, %v385_v61   ;;  %701 = vperm.xlu0 %1168, %v384_v62   ;;  %v194_v61 = vld [vmem:[%s1276_s19 + $0xa0] sm:$0xff]  ;;  %v195_v62 = vld [vmem:[%s1276_s19 + $0xa8] sm:$0xff] }
  0x8a   : > { %v412_v5 = vpop.permute.xlu1 %411  ;;  %v402_v6 = vpop.permute.xlu0 %401 }
  0x8b   : > { %v778_v7 = vmul.f32 %v412_v5, %v178_v63  ;;  %v779_v8 = vmul.f32 %v412_v5, %v179_v0  ;;  %v774_v9 = vmul.f32 %v402_v6, %v174_v1  ;;  %v775_v10 = vmul.f32 %v402_v6, %v175_v2  ;;  %716 = vperm.xlu1 %1169, %v387_v3   ;;  %v397_v63 = vld [vmem:[%s1208_s15 + $0x248] sm:$0xff]  ;;  %v396_v0 = vld [vmem:[%s1208_s15 + $0x240] sm:$0xff] }
  0x8c   : > { %711 = vperm.xlu0 %1168, %v386_v4  }
  0x8d   : > { %929 = vst [vmem:[%s1287_s22 + $0x20] sm:$0xff] %v778_v7  ;;  %930 = vst.msk [vmem:[%s1287_s22 + $0x28] sm:$0xff] %vm925_vm0, %v779_v8  ;;  %v200_v7 = vld [vmem:[%s1276_s19 + $0xd0] sm:$0xff]  ;;  %v201_v8 = vld [vmem:[%s1276_s19 + $0xd8] sm:$0xff] }
  0x8e   : > { %924 = vst [vmem:[%s1287_s22] sm:$0xff] %v774_v9  ;;  %926 = vst.msk [vmem:[%s1287_s22 + $0x8] sm:$0xff] %vm925_vm0, %v775_v10  ;;  %v417_v17 = vpop.permute.xlu1 %416  ;;  %v407_v18 = vpop.permute.xlu0 %406  ;;  %v198_v9 = vld [vmem:[%s1276_s19 + $0xc0] sm:$0xff]  ;;  %v199_v10 = vld [vmem:[%s1276_s19 + $0xc8] sm:$0xff] }
  0x8f   : > { %v780_v19 = vmul.f32 %v417_v17, %v180_v11  ;;  %v781_v20 = vmul.f32 %v417_v17, %v181_v12  ;;  %v776_v21 = vmul.f32 %v407_v18, %v176_v13  ;;  %v777_v22 = vmul.f32 %v407_v18, %v177_v14  ;;  %726 = vperm.xlu1 %1169, %v389_v15   ;;  %v398_v11 = vld [vmem:[%s1208_s15 + $0x250] sm:$0xff] }
  0x90   : > { %721 = vperm.xlu0 %1168, %v388_v16   ;;  %v204_v18 = vld [vmem:[%s1276_s19 + $0xf0] sm:$0xff] }
  0x91   : > { %931 = vst [vmem:[%s1287_s22 + $0x30] sm:$0xff] %v780_v19  ;;  %932 = vst.msk [vmem:[%s1287_s22 + $0x38] sm:$0xff] %vm925_vm0, %v781_v20  ;;  %v205_v19 = vld [vmem:[%s1276_s19 + $0xf8] sm:$0xff]  ;;  %v202_v20 = vld [vmem:[%s1276_s19 + $0xe0] sm:$0xff] }
  0x92   : > { %927 = vst [vmem:[%s1287_s22 + $0x10] sm:$0xff] %v776_v21  ;;  %928 = vst.msk [vmem:[%s1287_s22 + $0x18] sm:$0xff] %vm925_vm0, %v777_v22  ;;  %v427_v29 = vpop.permute.xlu1 %426  ;;  %v422_v30 = vpop.permute.xlu0 %421  ;;  %v203_v21 = vld [vmem:[%s1276_s19 + $0xe8] sm:$0xff] }
  0x93   : > { %v784_v31 = vmul.f32 %v427_v29, %v184_v23  ;;  %v785_v32 = vmul.f32 %v427_v29, %v185_v24  ;;  %v782_v33 = vmul.f32 %v422_v30, %v182_v25  ;;  %v783_v34 = vmul.f32 %v422_v30, %v183_v26  ;;  %736 = vperm.xlu1 %1169, %v391_v27   ;;  %v209_v29 = vld [vmem:[%s1276_s19 + $0x118] sm:$0xff]  ;;  %v206_v30 = vld [vmem:[%s1276_s19 + $0x100] sm:$0xff] }
  0x94   : > { %731 = vperm.xlu0 %1168, %v390_v28   ;;  %v208_v28 = vld [vmem:[%s1276_s19 + $0x110] sm:$0xff] }
  0x95   : > { %935 = vst [vmem:[%s1287_s22 + $0x50] sm:$0xff] %v784_v31  ;;  %936 = vst.msk [vmem:[%s1287_s22 + $0x58] sm:$0xff] %vm925_vm0, %v785_v32  ;;  %v207_v31 = vld [vmem:[%s1276_s19 + $0x108] sm:$0xff] }
  0x96   : > { %933 = vst [vmem:[%s1287_s22 + $0x40] sm:$0xff] %v782_v33  ;;  %934 = vst.msk [vmem:[%s1287_s22 + $0x48] sm:$0xff] %vm925_vm0, %v783_v34  ;;  %v437_v41 = vpop.permute.xlu1 %436  ;;  %v432_v42 = vpop.permute.xlu0 %431 }
  0x97   : > { %v788_v43 = vmul.f32 %v437_v41, %v188_v35  ;;  %v789_v44 = vmul.f32 %v437_v41, %v189_v36  ;;  %v786_v45 = vmul.f32 %v432_v42, %v186_v37  ;;  %v787_v46 = vmul.f32 %v432_v42, %v187_v38  ;;  %746 = vperm.xlu1 %1169, %v393_v39   ;;  %v212_v38 = vld [vmem:[%s1276_s19 + $0x130] sm:$0xff]  ;;  %v213_v39 = vld [vmem:[%s1276_s19 + $0x138] sm:$0xff]  ;;  %v211_v41 = vld [vmem:[%s1276_s19 + $0x128] sm:$0xff] }
  0x98   : > { %741 = vperm.xlu0 %1168, %v392_v40   ;;  %v210_v40 = vld [vmem:[%s1276_s19 + $0x120] sm:$0xff] }
  0x99   : > { %939 = vst [vmem:[%s1287_s22 + $0x70] sm:$0xff] %v788_v43  ;;  %940 = vst.msk [vmem:[%s1287_s22 + $0x78] sm:$0xff] %vm925_vm0, %v789_v44 }
  0x9a   : > { %937 = vst [vmem:[%s1287_s22 + $0x60] sm:$0xff] %v786_v45  ;;  %938 = vst.msk [vmem:[%s1287_s22 + $0x68] sm:$0xff] %vm925_vm0, %v787_v46  ;;  %v447_v53 = vpop.permute.xlu1 %446  ;;  %v442_v54 = vpop.permute.xlu0 %441 }
  0x9b   : > { %v792_v55 = vmul.f32 %v447_v53, %v192_v47  ;;  %v793_v56 = vmul.f32 %v447_v53, %v193_v48  ;;  %v790_v57 = vmul.f32 %v442_v54, %v190_v49  ;;  %v791_v58 = vmul.f32 %v442_v54, %v191_v50  ;;  %756 = vperm.xlu1 %1169, %v395_v51   ;;  %v216_v48 = vld [vmem:[%s1276_s19 + $0x150] sm:$0xff]  ;;  %v217_v49 = vld [vmem:[%s1276_s19 + $0x158] sm:$0xff]  ;;  %v214_v50 = vld [vmem:[%s1276_s19 + $0x140] sm:$0xff] }
  0x9c   : > { %751 = vperm.xlu0 %1168, %v394_v52   ;;  %v215_v51 = vld [vmem:[%s1276_s19 + $0x148] sm:$0xff] }
  0x9d   : > { %943 = vst [vmem:[%s1287_s22 + $0x90] sm:$0xff] %v792_v55  ;;  %944 = vst.msk [vmem:[%s1287_s22 + $0x98] sm:$0xff] %vm925_vm0, %v793_v56 }
  0x9e   : > { %941 = vst [vmem:[%s1287_s22 + $0x80] sm:$0xff] %v790_v57  ;;  %942 = vst.msk [vmem:[%s1287_s22 + $0x88] sm:$0xff] %vm925_vm0, %v791_v58  ;;  %v457_v1 = vpop.permute.xlu1 %456  ;;  %v452_v2 = vpop.permute.xlu0 %451  ;;  %v220_v58 = vld [vmem:[%s1276_s19 + $0x170] sm:$0xff] }
  0x9f   : > { %v796_v3 = vmul.f32 %v457_v1, %v196_v59  ;;  %v797_v4 = vmul.f32 %v457_v1, %v197_v60  ;;  %v794_v5 = vmul.f32 %v452_v2, %v194_v61  ;;  %v795_v6 = vmul.f32 %v452_v2, %v195_v62  ;;  %766 = vperm.xlu1 %1169, %v397_v63   ;;  %v221_v59 = vld [vmem:[%s1276_s19 + $0x178] sm:$0xff]  ;;  %v218_v60 = vld [vmem:[%s1276_s19 + $0x160] sm:$0xff]  ;;  %v219_v61 = vld [vmem:[%s1276_s19 + $0x168] sm:$0xff] }
  0xa0   : > { %761 = vperm.xlu0 %1168, %v396_v0  }
  0xa1   : > { %947 = vst [vmem:[%s1287_s22 + $0xb0] sm:$0xff] %v796_v3  ;;  %948 = vst.msk [vmem:[%s1287_s22 + $0xb8] sm:$0xff] %vm925_vm0, %v797_v4  ;;  %v224_v4 = vld [vmem:[%s1276_s19 + $0x190] sm:$0xff] }
  0xa2   : > { %945 = vst [vmem:[%s1287_s22 + $0xa0] sm:$0xff] %v794_v5  ;;  %946 = vst.msk [vmem:[%s1287_s22 + $0xa8] sm:$0xff] %vm925_vm0, %v795_v6  ;;  %v467_v12 = vpop.permute.xlu1 %466  ;;  %v462_v13 = vpop.permute.xlu0 %461  ;;  %v225_v5 = vld [vmem:[%s1276_s19 + $0x198] sm:$0xff]  ;;  %v222_v6 = vld [vmem:[%s1276_s19 + $0x180] sm:$0xff] }
  0xa3   : > { %v800_v14 = vmul.f32 %v467_v12, %v200_v7  ;;  %v801_v15 = vmul.f32 %v467_v12, %v201_v8  ;;  %v798_v16 = vmul.f32 %v462_v13, %v198_v9  ;;  %v799_v17 = vmul.f32 %v462_v13, %v199_v10  ;;  %v223_v7 = vld [vmem:[%s1276_s19 + $0x188] sm:$0xff] }
  0xa4   : > { %771 = vperm.xlu0 %1168, %v398_v11  }
  0xa5   : > { %951 = vst [vmem:[%s1287_s22 + $0xd0] sm:$0xff] %v800_v14  ;;  %952 = vst.msk [vmem:[%s1287_s22 + $0xd8] sm:$0xff] %vm925_vm0, %v801_v15  ;;  %v228_v14 = vld [vmem:[%s1276_s19 + $0x1b0] sm:$0xff]  ;;  %v229_v15 = vld [vmem:[%s1276_s19 + $0x1b8] sm:$0xff] }
  0xa6   : > { %949 = vst [vmem:[%s1287_s22 + $0xc0] sm:$0xff] %v798_v16  ;;  %950 = vst.msk [vmem:[%s1287_s22 + $0xc8] sm:$0xff] %vm925_vm0, %v799_v17  ;;  %v477_v22 = vpop.permute.xlu1 %476  ;;  %v472_v23 = vpop.permute.xlu0 %471  ;;  %v226_v16 = vld [vmem:[%s1276_s19 + $0x1a0] sm:$0xff]  ;;  %v227_v17 = vld [vmem:[%s1276_s19 + $0x1a8] sm:$0xff] }
  0xa7   : > { %v804_v24 = vmul.f32 %v477_v22, %v204_v18  ;;  %v805_v25 = vmul.f32 %v477_v22, %v205_v19  ;;  %v802_v26 = vmul.f32 %v472_v23, %v202_v20  ;;  %v803_v27 = vmul.f32 %v472_v23, %v203_v21 }
  0xa9   : > { %955 = vst [vmem:[%s1287_s22 + $0xf0] sm:$0xff] %v804_v24  ;;  %956 = vst.msk [vmem:[%s1287_s22 + $0xf8] sm:$0xff] %vm925_vm0, %v805_v25  ;;  %v232_v24 = vld [vmem:[%s1276_s19 + $0x1d0] sm:$0xff]  ;;  %v233_v25 = vld [vmem:[%s1276_s19 + $0x1d8] sm:$0xff] }
  0xaa   : > { %953 = vst [vmem:[%s1287_s22 + $0xe0] sm:$0xff] %v802_v26  ;;  %954 = vst.msk [vmem:[%s1287_s22 + $0xe8] sm:$0xff] %vm925_vm0, %v803_v27  ;;  %v487_v32 = vpop.permute.xlu1 %486  ;;  %v482_v33 = vpop.permute.xlu0 %481  ;;  %v230_v26 = vld [vmem:[%s1276_s19 + $0x1c0] sm:$0xff]  ;;  %v231_v27 = vld [vmem:[%s1276_s19 + $0x1c8] sm:$0xff] }
  0xab   : > { %v808_v34 = vmul.f32 %v487_v32, %v208_v28  ;;  %v809_v35 = vmul.f32 %v487_v32, %v209_v29  ;;  %v806_v36 = vmul.f32 %v482_v33, %v206_v30  ;;  %v807_v37 = vmul.f32 %v482_v33, %v207_v31 }
  0xad   : > { %959 = vst [vmem:[%s1287_s22 + $0x110] sm:$0xff] %v808_v34  ;;  %960 = vst.msk [vmem:[%s1287_s22 + $0x118] sm:$0xff] %vm925_vm0, %v809_v35  ;;  %v236_v34 = vld [vmem:[%s1276_s19 + $0x1f0] sm:$0xff]  ;;  %v237_v35 = vld [vmem:[%s1276_s19 + $0x1f8] sm:$0xff] }
  0xae   : > { %957 = vst [vmem:[%s1287_s22 + $0x100] sm:$0xff] %v806_v36  ;;  %958 = vst.msk [vmem:[%s1287_s22 + $0x108] sm:$0xff] %vm925_vm0, %v807_v37  ;;  %v497_v42 = vpop.permute.xlu1 %496  ;;  %v492_v43 = vpop.permute.xlu0 %491  ;;  %v234_v36 = vld [vmem:[%s1276_s19 + $0x1e0] sm:$0xff]  ;;  %v235_v37 = vld [vmem:[%s1276_s19 + $0x1e8] sm:$0xff] }
  0xaf   : > { %v812_v44 = vmul.f32 %v497_v42, %v212_v38  ;;  %v813_v45 = vmul.f32 %v497_v42, %v213_v39  ;;  %v810_v46 = vmul.f32 %v492_v43, %v210_v40  ;;  %v811_v47 = vmul.f32 %v492_v43, %v211_v41 }
  0xb1   : > { %963 = vst [vmem:[%s1287_s22 + $0x130] sm:$0xff] %v812_v44  ;;  %964 = vst.msk [vmem:[%s1287_s22 + $0x138] sm:$0xff] %vm925_vm0, %v813_v45  ;;  %v240_v44 = vld [vmem:[%s1276_s19 + $0x210] sm:$0xff]  ;;  %v241_v45 = vld [vmem:[%s1276_s19 + $0x218] sm:$0xff] }
  0xb2   : > { %961 = vst [vmem:[%s1287_s22 + $0x120] sm:$0xff] %v810_v46  ;;  %962 = vst.msk [vmem:[%s1287_s22 + $0x128] sm:$0xff] %vm925_vm0, %v811_v47  ;;  %v507_v52 = vpop.permute.xlu1 %506  ;;  %v502_v53 = vpop.permute.xlu0 %501  ;;  %v238_v46 = vld [vmem:[%s1276_s19 + $0x200] sm:$0xff]  ;;  %v239_v47 = vld [vmem:[%s1276_s19 + $0x208] sm:$0xff] }
  0xb3   : > { %v816_v54 = vmul.f32 %v507_v52, %v216_v48  ;;  %v817_v55 = vmul.f32 %v507_v52, %v217_v49  ;;  %v814_v56 = vmul.f32 %v502_v53, %v214_v50  ;;  %v815_v57 = vmul.f32 %v502_v53, %v215_v51 }
  0xb5   : > { %967 = vst [vmem:[%s1287_s22 + $0x150] sm:$0xff] %v816_v54  ;;  %968 = vst.msk [vmem:[%s1287_s22 + $0x158] sm:$0xff] %vm925_vm0, %v817_v55  ;;  %v244_v54 = vld [vmem:[%s1276_s19 + $0x230] sm:$0xff]  ;;  %v245_v55 = vld [vmem:[%s1276_s19 + $0x238] sm:$0xff] }
  0xb6   : > { %965 = vst [vmem:[%s1287_s22 + $0x140] sm:$0xff] %v814_v56  ;;  %966 = vst.msk [vmem:[%s1287_s22 + $0x148] sm:$0xff] %vm925_vm0, %v815_v57  ;;  %v517_v62 = vpop.permute.xlu1 %516  ;;  %v512_v63 = vpop.permute.xlu0 %511  ;;  %v242_v56 = vld [vmem:[%s1276_s19 + $0x220] sm:$0xff]  ;;  %v243_v57 = vld [vmem:[%s1276_s19 + $0x228] sm:$0xff] }
  0xb7   : > { %v820_v0 = vmul.f32 %v517_v62, %v220_v58  ;;  %v821_v1 = vmul.f32 %v517_v62, %v221_v59  ;;  %v818_v2 = vmul.f32 %v512_v63, %v218_v60  ;;  %v819_v3 = vmul.f32 %v512_v63, %v219_v61 }
  0xb9   : > { %971 = vst [vmem:[%s1287_s22 + $0x170] sm:$0xff] %v820_v0  ;;  %972 = vst.msk [vmem:[%s1287_s22 + $0x178] sm:$0xff] %vm925_vm0, %v821_v1  ;;  %v248_v0 = vld [vmem:[%s1276_s19 + $0x250] sm:$0xff]  ;;  %v249_v1 = vld [vmem:[%s1276_s19 + $0x258] sm:$0xff] }
  0xba   : > { %969 = vst [vmem:[%s1287_s22 + $0x160] sm:$0xff] %v818_v2  ;;  %970 = vst.msk [vmem:[%s1287_s22 + $0x168] sm:$0xff] %vm925_vm0, %v819_v3  ;;  %v527_v8 = vpop.permute.xlu1 %526  ;;  %v522_v9 = vpop.permute.xlu0 %521  ;;  %v246_v2 = vld [vmem:[%s1276_s19 + $0x240] sm:$0xff]  ;;  %v247_v3 = vld [vmem:[%s1276_s19 + $0x248] sm:$0xff] }
  0xbb   : > { %v824_v10 = vmul.f32 %v527_v8, %v224_v4  ;;  %v825_v11 = vmul.f32 %v527_v8, %v225_v5  ;;  %v822_v12 = vmul.f32 %v522_v9, %v222_v6  ;;  %v823_v13 = vmul.f32 %v522_v9, %v223_v7 }
  0xbd   : > { %975 = vst [vmem:[%s1287_s22 + $0x190] sm:$0xff] %v824_v10  ;;  %976 = vst.msk [vmem:[%s1287_s22 + $0x198] sm:$0xff] %vm925_vm0, %v825_v11  ;;  %v252_v10 = vld [vmem:[%s1276_s19 + $0x270] sm:$0xff]  ;;  %v253_v11 = vld [vmem:[%s1276_s19 + $0x278] sm:$0xff] }
  0xbe   : > { %973 = vst [vmem:[%s1287_s22 + $0x180] sm:$0xff] %v822_v12  ;;  %974 = vst.msk [vmem:[%s1287_s22 + $0x188] sm:$0xff] %vm925_vm0, %v823_v13  ;;  %v537_v18 = vpop.permute.xlu1 %536  ;;  %v532_v19 = vpop.permute.xlu0 %531  ;;  %v250_v12 = vld [vmem:[%s1276_s19 + $0x260] sm:$0xff]  ;;  %v251_v13 = vld [vmem:[%s1276_s19 + $0x268] sm:$0xff] }
  0xbf   : > { %v828_v20 = vmul.f32 %v537_v18, %v228_v14  ;;  %v829_v21 = vmul.f32 %v537_v18, %v229_v15  ;;  %v826_v22 = vmul.f32 %v532_v19, %v226_v16  ;;  %v827_v23 = vmul.f32 %v532_v19, %v227_v17 }
  0xc1   : > { %979 = vst [vmem:[%s1287_s22 + $0x1b0] sm:$0xff] %v828_v20  ;;  %980 = vst.msk [vmem:[%s1287_s22 + $0x1b8] sm:$0xff] %vm925_vm0, %v829_v21  ;;  %v256_v20 = vld [vmem:[%s1276_s19 + $0x290] sm:$0xff]  ;;  %v257_v21 = vld [vmem:[%s1276_s19 + $0x298] sm:$0xff] }
  0xc2   : > { %977 = vst [vmem:[%s1287_s22 + $0x1a0] sm:$0xff] %v826_v22  ;;  %978 = vst.msk [vmem:[%s1287_s22 + $0x1a8] sm:$0xff] %vm925_vm0, %v827_v23  ;;  %v547_v28 = vpop.permute.xlu1 %546  ;;  %v542_v29 = vpop.permute.xlu0 %541  ;;  %v254_v22 = vld [vmem:[%s1276_s19 + $0x280] sm:$0xff]  ;;  %v255_v23 = vld [vmem:[%s1276_s19 + $0x288] sm:$0xff] }
  0xc3   : > { %v832_v30 = vmul.f32 %v547_v28, %v232_v24  ;;  %v833_v31 = vmul.f32 %v547_v28, %v233_v25  ;;  %v830_v32 = vmul.f32 %v542_v29, %v230_v26  ;;  %v831_v33 = vmul.f32 %v542_v29, %v231_v27 }
  0xc5   : > { %983 = vst [vmem:[%s1287_s22 + $0x1d0] sm:$0xff] %v832_v30  ;;  %984 = vst.msk [vmem:[%s1287_s22 + $0x1d8] sm:$0xff] %vm925_vm0, %v833_v31  ;;  %v260_v30 = vld [vmem:[%s1276_s19 + $0x2b0] sm:$0xff]  ;;  %v261_v31 = vld [vmem:[%s1276_s19 + $0x2b8] sm:$0xff] }
  0xc6   : > { %981 = vst [vmem:[%s1287_s22 + $0x1c0] sm:$0xff] %v830_v32  ;;  %982 = vst.msk [vmem:[%s1287_s22 + $0x1c8] sm:$0xff] %vm925_vm0, %v831_v33  ;;  %v557_v38 = vpop.permute.xlu1 %556  ;;  %v552_v39 = vpop.permute.xlu0 %551  ;;  %v258_v32 = vld [vmem:[%s1276_s19 + $0x2a0] sm:$0xff]  ;;  %v259_v33 = vld [vmem:[%s1276_s19 + $0x2a8] sm:$0xff] }
  0xc7   : > { %v836_v40 = vmul.f32 %v557_v38, %v236_v34  ;;  %v837_v41 = vmul.f32 %v557_v38, %v237_v35  ;;  %v834_v42 = vmul.f32 %v552_v39, %v234_v36  ;;  %v835_v43 = vmul.f32 %v552_v39, %v235_v37 }
  0xc9   : > { %987 = vst [vmem:[%s1287_s22 + $0x1f0] sm:$0xff] %v836_v40  ;;  %988 = vst.msk [vmem:[%s1287_s22 + $0x1f8] sm:$0xff] %vm925_vm0, %v837_v41  ;;  %v264_v40 = vld [vmem:[%s1276_s19 + $0x2d0] sm:$0xff]  ;;  %v265_v41 = vld [vmem:[%s1276_s19 + $0x2d8] sm:$0xff] }
  0xca   : > { %985 = vst [vmem:[%s1287_s22 + $0x1e0] sm:$0xff] %v834_v42  ;;  %986 = vst.msk [vmem:[%s1287_s22 + $0x1e8] sm:$0xff] %vm925_vm0, %v835_v43  ;;  %v567_v48 = vpop.permute.xlu1 %566  ;;  %v562_v49 = vpop.permute.xlu0 %561  ;;  %v262_v42 = vld [vmem:[%s1276_s19 + $0x2c0] sm:$0xff]  ;;  %v263_v43 = vld [vmem:[%s1276_s19 + $0x2c8] sm:$0xff] }
  0xcb   : > { %v840_v50 = vmul.f32 %v567_v48, %v240_v44  ;;  %v841_v51 = vmul.f32 %v567_v48, %v241_v45  ;;  %v838_v52 = vmul.f32 %v562_v49, %v238_v46  ;;  %v839_v53 = vmul.f32 %v562_v49, %v239_v47 }
  0xcd   : > { %991 = vst [vmem:[%s1287_s22 + $0x210] sm:$0xff] %v840_v50  ;;  %992 = vst.msk [vmem:[%s1287_s22 + $0x218] sm:$0xff] %vm925_vm0, %v841_v51  ;;  %v268_v50 = vld [vmem:[%s1276_s19 + $0x2f0] sm:$0xff]  ;;  %v269_v51 = vld [vmem:[%s1276_s19 + $0x2f8] sm:$0xff] }
  0xce   : > { %989 = vst [vmem:[%s1287_s22 + $0x200] sm:$0xff] %v838_v52  ;;  %990 = vst.msk [vmem:[%s1287_s22 + $0x208] sm:$0xff] %vm925_vm0, %v839_v53  ;;  %v577_v58 = vpop.permute.xlu1 %576  ;;  %v572_v59 = vpop.permute.xlu0 %571  ;;  %v266_v52 = vld [vmem:[%s1276_s19 + $0x2e0] sm:$0xff]  ;;  %v267_v53 = vld [vmem:[%s1276_s19 + $0x2e8] sm:$0xff] }
  0xcf   : > { %v844_v60 = vmul.f32 %v577_v58, %v244_v54  ;;  %v845_v61 = vmul.f32 %v577_v58, %v245_v55  ;;  %v842_v62 = vmul.f32 %v572_v59, %v242_v56  ;;  %v843_v63 = vmul.f32 %v572_v59, %v243_v57 }
  0xd1   : > { %995 = vst [vmem:[%s1287_s22 + $0x230] sm:$0xff] %v844_v60  ;;  %996 = vst.msk [vmem:[%s1287_s22 + $0x238] sm:$0xff] %vm925_vm0, %v845_v61  ;;  %v272_v60 = vld [vmem:[%s1276_s19 + $0x310] sm:$0xff]  ;;  %v273_v61 = vld [vmem:[%s1276_s19 + $0x318] sm:$0xff] }
  0xd2   : > { %993 = vst [vmem:[%s1287_s22 + $0x220] sm:$0xff] %v842_v62  ;;  %994 = vst.msk [vmem:[%s1287_s22 + $0x228] sm:$0xff] %vm925_vm0, %v843_v63  ;;  %v587_v4 = vpop.permute.xlu1 %586  ;;  %v582_v5 = vpop.permute.xlu0 %581  ;;  %v270_v62 = vld [vmem:[%s1276_s19 + $0x300] sm:$0xff]  ;;  %v271_v63 = vld [vmem:[%s1276_s19 + $0x308] sm:$0xff] }
  0xd3   : > { %v848_v6 = vmul.f32 %v587_v4, %v248_v0  ;;  %v849_v7 = vmul.f32 %v587_v4, %v249_v1  ;;  %v846_v8 = vmul.f32 %v582_v5, %v246_v2  ;;  %v847_v9 = vmul.f32 %v582_v5, %v247_v3 }
  0xd5   : > { %999 = vst [vmem:[%s1287_s22 + $0x250] sm:$0xff] %v848_v6  ;;  %1000 = vst.msk [vmem:[%s1287_s22 + $0x258] sm:$0xff] %vm925_vm0, %v849_v7  ;;  %v276_v6 = vld [vmem:[%s1276_s19 + $0x330] sm:$0xff]  ;;  %v277_v7 = vld [vmem:[%s1276_s19 + $0x338] sm:$0xff] }
  0xd6   : > { %997 = vst [vmem:[%s1287_s22 + $0x240] sm:$0xff] %v846_v8  ;;  %998 = vst.msk [vmem:[%s1287_s22 + $0x248] sm:$0xff] %vm925_vm0, %v847_v9  ;;  %v597_v14 = vpop.permute.xlu1 %596  ;;  %v592_v15 = vpop.permute.xlu0 %591  ;;  %v274_v8 = vld [vmem:[%s1276_s19 + $0x320] sm:$0xff]  ;;  %v275_v9 = vld [vmem:[%s1276_s19 + $0x328] sm:$0xff] }
  0xd7   : > { %v852_v16 = vmul.f32 %v597_v14, %v252_v10  ;;  %v853_v17 = vmul.f32 %v597_v14, %v253_v11  ;;  %v850_v18 = vmul.f32 %v592_v15, %v250_v12  ;;  %v851_v19 = vmul.f32 %v592_v15, %v251_v13 }
  0xd9   : > { %1003 = vst [vmem:[%s1287_s22 + $0x270] sm:$0xff] %v852_v16  ;;  %1004 = vst.msk [vmem:[%s1287_s22 + $0x278] sm:$0xff] %vm925_vm0, %v853_v17  ;;  %v280_v16 = vld [vmem:[%s1276_s19 + $0x350] sm:$0xff]  ;;  %v281_v17 = vld [vmem:[%s1276_s19 + $0x358] sm:$0xff] }
  0xda   : > { %1001 = vst [vmem:[%s1287_s22 + $0x260] sm:$0xff] %v850_v18  ;;  %1002 = vst.msk [vmem:[%s1287_s22 + $0x268] sm:$0xff] %vm925_vm0, %v851_v19  ;;  %v607_v24 = vpop.permute.xlu1 %606  ;;  %v602_v25 = vpop.permute.xlu0 %601  ;;  %v278_v18 = vld [vmem:[%s1276_s19 + $0x340] sm:$0xff]  ;;  %v279_v19 = vld [vmem:[%s1276_s19 + $0x348] sm:$0xff] }
  0xdb   : > { %v856_v26 = vmul.f32 %v607_v24, %v256_v20  ;;  %v857_v27 = vmul.f32 %v607_v24, %v257_v21  ;;  %v854_v28 = vmul.f32 %v602_v25, %v254_v22  ;;  %v855_v29 = vmul.f32 %v602_v25, %v255_v23 }
  0xdd   : > { %1007 = vst [vmem:[%s1287_s22 + $0x290] sm:$0xff] %v856_v26  ;;  %1008 = vst.msk [vmem:[%s1287_s22 + $0x298] sm:$0xff] %vm925_vm0, %v857_v27  ;;  %v284_v26 = vld [vmem:[%s1276_s19 + $0x370] sm:$0xff]  ;;  %v285_v27 = vld [vmem:[%s1276_s19 + $0x378] sm:$0xff] }
  0xde   : > { %1005 = vst [vmem:[%s1287_s22 + $0x280] sm:$0xff] %v854_v28  ;;  %1006 = vst.msk [vmem:[%s1287_s22 + $0x288] sm:$0xff] %vm925_vm0, %v855_v29  ;;  %v617_v34 = vpop.permute.xlu1 %616  ;;  %v612_v35 = vpop.permute.xlu0 %611  ;;  %v282_v28 = vld [vmem:[%s1276_s19 + $0x360] sm:$0xff]  ;;  %v283_v29 = vld [vmem:[%s1276_s19 + $0x368] sm:$0xff] }
  0xdf   : > { %v860_v36 = vmul.f32 %v617_v34, %v260_v30  ;;  %v861_v37 = vmul.f32 %v617_v34, %v261_v31  ;;  %v858_v38 = vmul.f32 %v612_v35, %v258_v32  ;;  %v859_v39 = vmul.f32 %v612_v35, %v259_v33 }
  0xe1   : > { %1011 = vst [vmem:[%s1287_s22 + $0x2b0] sm:$0xff] %v860_v36  ;;  %1012 = vst.msk [vmem:[%s1287_s22 + $0x2b8] sm:$0xff] %vm925_vm0, %v861_v37  ;;  %v288_v36 = vld [vmem:[%s1276_s19 + $0x390] sm:$0xff]  ;;  %v289_v37 = vld [vmem:[%s1276_s19 + $0x398] sm:$0xff] }
  0xe2   : > { %1009 = vst [vmem:[%s1287_s22 + $0x2a0] sm:$0xff] %v858_v38  ;;  %1010 = vst.msk [vmem:[%s1287_s22 + $0x2a8] sm:$0xff] %vm925_vm0, %v859_v39  ;;  %v627_v44 = vpop.permute.xlu1 %626  ;;  %v622_v45 = vpop.permute.xlu0 %621  ;;  %v286_v38 = vld [vmem:[%s1276_s19 + $0x380] sm:$0xff]  ;;  %v287_v39 = vld [vmem:[%s1276_s19 + $0x388] sm:$0xff] }
  0xe3   : > { %v864_v46 = vmul.f32 %v627_v44, %v264_v40  ;;  %v865_v47 = vmul.f32 %v627_v44, %v265_v41  ;;  %v862_v48 = vmul.f32 %v622_v45, %v262_v42  ;;  %v863_v49 = vmul.f32 %v622_v45, %v263_v43 }
  0xe5   : > { %1015 = vst [vmem:[%s1287_s22 + $0x2d0] sm:$0xff] %v864_v46  ;;  %1016 = vst.msk [vmem:[%s1287_s22 + $0x2d8] sm:$0xff] %vm925_vm0, %v865_v47  ;;  %v292_v46 = vld [vmem:[%s1276_s19 + $0x3b0] sm:$0xff]  ;;  %v293_v47 = vld [vmem:[%s1276_s19 + $0x3b8] sm:$0xff] }
  0xe6   : > { %1013 = vst [vmem:[%s1287_s22 + $0x2c0] sm:$0xff] %v862_v48  ;;  %1014 = vst.msk [vmem:[%s1287_s22 + $0x2c8] sm:$0xff] %vm925_vm0, %v863_v49  ;;  %v637_v54 = vpop.permute.xlu1 %636  ;;  %v632_v55 = vpop.permute.xlu0 %631  ;;  %v290_v48 = vld [vmem:[%s1276_s19 + $0x3a0] sm:$0xff]  ;;  %v291_v49 = vld [vmem:[%s1276_s19 + $0x3a8] sm:$0xff] }
  0xe7   : > { %v868_v56 = vmul.f32 %v637_v54, %v268_v50  ;;  %v869_v57 = vmul.f32 %v637_v54, %v269_v51  ;;  %v866_v58 = vmul.f32 %v632_v55, %v266_v52  ;;  %v867_v59 = vmul.f32 %v632_v55, %v267_v53 }
  0xe9   : > { %1019 = vst [vmem:[%s1287_s22 + $0x2f0] sm:$0xff] %v868_v56  ;;  %1020 = vst.msk [vmem:[%s1287_s22 + $0x2f8] sm:$0xff] %vm925_vm0, %v869_v57  ;;  %v296_v56 = vld [vmem:[%s1276_s19 + $0x3d0] sm:$0xff]  ;;  %v297_v57 = vld [vmem:[%s1276_s19 + $0x3d8] sm:$0xff] }
  0xea   : > { %1017 = vst [vmem:[%s1287_s22 + $0x2e0] sm:$0xff] %v866_v58  ;;  %1018 = vst.msk [vmem:[%s1287_s22 + $0x2e8] sm:$0xff] %vm925_vm0, %v867_v59  ;;  %v647_v0 = vpop.permute.xlu1 %646  ;;  %v642_v1 = vpop.permute.xlu0 %641  ;;  %v294_v58 = vld [vmem:[%s1276_s19 + $0x3c0] sm:$0xff]  ;;  %v295_v59 = vld [vmem:[%s1276_s19 + $0x3c8] sm:$0xff] }
  0xeb   : > { %v872_v2 = vmul.f32 %v647_v0, %v272_v60  ;;  %v873_v3 = vmul.f32 %v647_v0, %v273_v61  ;;  %v870_v4 = vmul.f32 %v642_v1, %v270_v62  ;;  %v871_v5 = vmul.f32 %v642_v1, %v271_v63 }
  0xed   : > { %1023 = vst [vmem:[%s1287_s22 + $0x310] sm:$0xff] %v872_v2  ;;  %1024 = vst.msk [vmem:[%s1287_s22 + $0x318] sm:$0xff] %vm925_vm0, %v873_v3  ;;  %v300_v2 = vld [vmem:[%s1276_s19 + $0x3f0] sm:$0xff]  ;;  %v301_v3 = vld [vmem:[%s1276_s19 + $0x3f8] sm:$0xff] }
  0xee   : > { %1021 = vst [vmem:[%s1287_s22 + $0x300] sm:$0xff] %v870_v4  ;;  %1022 = vst.msk [vmem:[%s1287_s22 + $0x308] sm:$0xff] %vm925_vm0, %v871_v5  ;;  %v657_v10 = vpop.permute.xlu1 %656  ;;  %v652_v11 = vpop.permute.xlu0 %651  ;;  %v298_v4 = vld [vmem:[%s1276_s19 + $0x3e0] sm:$0xff]  ;;  %v299_v5 = vld [vmem:[%s1276_s19 + $0x3e8] sm:$0xff] }
  0xef   : > { %v876_v12 = vmul.f32 %v657_v10, %v276_v6  ;;  %v877_v13 = vmul.f32 %v657_v10, %v277_v7  ;;  %v874_v14 = vmul.f32 %v652_v11, %v274_v8  ;;  %v875_v15 = vmul.f32 %v652_v11, %v275_v9 }
  0xf1   : > { %1027 = vst [vmem:[%s1287_s22 + $0x330] sm:$0xff] %v876_v12  ;;  %1028 = vst.msk [vmem:[%s1287_s22 + $0x338] sm:$0xff] %vm925_vm0, %v877_v13  ;;  %v304_v12 = vld [vmem:[%s1276_s19 + $0x410] sm:$0xff]  ;;  %v305_v13 = vld [vmem:[%s1276_s19 + $0x418] sm:$0xff] }
  0xf2   : > { %1025 = vst [vmem:[%s1287_s22 + $0x320] sm:$0xff] %v874_v14  ;;  %1026 = vst.msk [vmem:[%s1287_s22 + $0x328] sm:$0xff] %vm925_vm0, %v875_v15  ;;  %v667_v20 = vpop.permute.xlu1 %666  ;;  %v662_v21 = vpop.permute.xlu0 %661  ;;  %v302_v14 = vld [vmem:[%s1276_s19 + $0x400] sm:$0xff]  ;;  %v303_v15 = vld [vmem:[%s1276_s19 + $0x408] sm:$0xff] }
  0xf3   : > { %v880_v22 = vmul.f32 %v667_v20, %v280_v16  ;;  %v881_v23 = vmul.f32 %v667_v20, %v281_v17  ;;  %v878_v24 = vmul.f32 %v662_v21, %v278_v18  ;;  %v879_v25 = vmul.f32 %v662_v21, %v279_v19 }
  0xf5   : > { %1031 = vst [vmem:[%s1287_s22 + $0x350] sm:$0xff] %v880_v22  ;;  %1032 = vst.msk [vmem:[%s1287_s22 + $0x358] sm:$0xff] %vm925_vm0, %v881_v23  ;;  %v308_v22 = vld [vmem:[%s1276_s19 + $0x430] sm:$0xff]  ;;  %v309_v23 = vld [vmem:[%s1276_s19 + $0x438] sm:$0xff] }
  0xf6   : > { %1029 = vst [vmem:[%s1287_s22 + $0x340] sm:$0xff] %v878_v24  ;;  %1030 = vst.msk [vmem:[%s1287_s22 + $0x348] sm:$0xff] %vm925_vm0, %v879_v25  ;;  %v677_v30 = vpop.permute.xlu1 %676  ;;  %v672_v31 = vpop.permute.xlu0 %671  ;;  %v306_v24 = vld [vmem:[%s1276_s19 + $0x420] sm:$0xff]  ;;  %v307_v25 = vld [vmem:[%s1276_s19 + $0x428] sm:$0xff] }
  0xf7   : > { %v884_v32 = vmul.f32 %v677_v30, %v284_v26  ;;  %v885_v33 = vmul.f32 %v677_v30, %v285_v27  ;;  %v882_v34 = vmul.f32 %v672_v31, %v282_v28  ;;  %v883_v35 = vmul.f32 %v672_v31, %v283_v29 }
  0xf9   : > { %1035 = vst [vmem:[%s1287_s22 + $0x370] sm:$0xff] %v884_v32  ;;  %1036 = vst.msk [vmem:[%s1287_s22 + $0x378] sm:$0xff] %vm925_vm0, %v885_v33  ;;  %v312_v32 = vld [vmem:[%s1276_s19 + $0x450] sm:$0xff]  ;;  %v313_v33 = vld [vmem:[%s1276_s19 + $0x458] sm:$0xff] }
  0xfa   : > { %1033 = vst [vmem:[%s1287_s22 + $0x360] sm:$0xff] %v882_v34  ;;  %1034 = vst.msk [vmem:[%s1287_s22 + $0x368] sm:$0xff] %vm925_vm0, %v883_v35  ;;  %v687_v40 = vpop.permute.xlu1 %686  ;;  %v682_v41 = vpop.permute.xlu0 %681  ;;  %v310_v34 = vld [vmem:[%s1276_s19 + $0x440] sm:$0xff]  ;;  %v311_v35 = vld [vmem:[%s1276_s19 + $0x448] sm:$0xff] }
  0xfb   : > { %v888_v42 = vmul.f32 %v687_v40, %v288_v36  ;;  %v889_v43 = vmul.f32 %v687_v40, %v289_v37  ;;  %v886_v44 = vmul.f32 %v682_v41, %v286_v38  ;;  %v887_v45 = vmul.f32 %v682_v41, %v287_v39 }
  0xfd   : > { %1039 = vst [vmem:[%s1287_s22 + $0x390] sm:$0xff] %v888_v42  ;;  %1040 = vst.msk [vmem:[%s1287_s22 + $0x398] sm:$0xff] %vm925_vm0, %v889_v43  ;;  %v316_v42 = vld [vmem:[%s1276_s19 + $0x470] sm:$0xff]  ;;  %v317_v43 = vld [vmem:[%s1276_s19 + $0x478] sm:$0xff] }
  0xfe   : > { %1037 = vst [vmem:[%s1287_s22 + $0x380] sm:$0xff] %v886_v44  ;;  %1038 = vst.msk [vmem:[%s1287_s22 + $0x388] sm:$0xff] %vm925_vm0, %v887_v45  ;;  %v697_v50 = vpop.permute.xlu1 %696  ;;  %v692_v51 = vpop.permute.xlu0 %691  ;;  %v314_v44 = vld [vmem:[%s1276_s19 + $0x460] sm:$0xff]  ;;  %v315_v45 = vld [vmem:[%s1276_s19 + $0x468] sm:$0xff] }
  0xff   : > { %v892_v52 = vmul.f32 %v697_v50, %v292_v46  ;;  %v893_v53 = vmul.f32 %v697_v50, %v293_v47  ;;  %v890_v54 = vmul.f32 %v692_v51, %v290_v48  ;;  %v891_v55 = vmul.f32 %v692_v51, %v291_v49 }
 0x101   : > { %1043 = vst [vmem:[%s1287_s22 + $0x3b0] sm:$0xff] %v892_v52  ;;  %1044 = vst.msk [vmem:[%s1287_s22 + $0x3b8] sm:$0xff] %vm925_vm0, %v893_v53  ;;  %v320_v52 = vld [vmem:[%s1276_s19 + $0x490] sm:$0xff]  ;;  %v321_v53 = vld [vmem:[%s1276_s19 + $0x498] sm:$0xff] }
 0x102   : > { %1041 = vst [vmem:[%s1287_s22 + $0x3a0] sm:$0xff] %v890_v54  ;;  %1042 = vst.msk [vmem:[%s1287_s22 + $0x3a8] sm:$0xff] %vm925_vm0, %v891_v55  ;;  %v707_v60 = vpop.permute.xlu1 %706  ;;  %v702_v61 = vpop.permute.xlu0 %701  ;;  %v318_v54 = vld [vmem:[%s1276_s19 + $0x480] sm:$0xff]  ;;  %v319_v55 = vld [vmem:[%s1276_s19 + $0x488] sm:$0xff] }
 0x103   : > { %v896_v62 = vmul.f32 %v707_v60, %v296_v56  ;;  %v897_v63 = vmul.f32 %v707_v60, %v297_v57  ;;  %v894_v0 = vmul.f32 %v702_v61, %v294_v58  ;;  %v895_v1 = vmul.f32 %v702_v61, %v295_v59 }
 0x105   : > { %1047 = vst [vmem:[%s1287_s22 + $0x3d0] sm:$0xff] %v896_v62  ;;  %1048 = vst.msk [vmem:[%s1287_s22 + $0x3d8] sm:$0xff] %vm925_vm0, %v897_v63  ;;  %v322_v62 = vld [vmem:[%s1276_s19 + $0x4a0] sm:$0xff]  ;;  %v323_v63 = vld [vmem:[%s1276_s19 + $0x4a8] sm:$0xff] }
 0x106   : > { %1045 = vst [vmem:[%s1287_s22 + $0x3c0] sm:$0xff] %v894_v0  ;;  %1046 = vst.msk [vmem:[%s1287_s22 + $0x3c8] sm:$0xff] %vm925_vm0, %v895_v1  ;;  %v717_v6 = vpop.permute.xlu1 %716 }
 0x107   : > { %v900_v7 = vmul.f32 %v717_v6, %v300_v2  ;;  %v901_v8 = vmul.f32 %v717_v6, %v301_v3  ;;  %v712_v9 = vpop.permute.xlu0 %711 }
 0x108   : > { %v898_v10 = vmul.f32 %v712_v9, %v298_v4  ;;  %v899_v11 = vmul.f32 %v712_v9, %v299_v5 }
 0x109   : > { %1051 = vst [vmem:[%s1287_s22 + $0x3f0] sm:$0xff] %v900_v7  ;;  %1052 = vst.msk [vmem:[%s1287_s22 + $0x3f8] sm:$0xff] %vm925_vm0, %v901_v8 }
 0x10a   : > { %1049 = vst [vmem:[%s1287_s22 + $0x3e0] sm:$0xff] %v898_v10  ;;  %1050 = vst.msk [vmem:[%s1287_s22 + $0x3e8] sm:$0xff] %vm925_vm0, %v899_v11  ;;  %v727_v16 = vpop.permute.xlu1 %726 }
 0x10b   : > { %v904_v17 = vmul.f32 %v727_v16, %v304_v12  ;;  %v905_v18 = vmul.f32 %v727_v16, %v305_v13  ;;  %v722_v19 = vpop.permute.xlu0 %721 }
 0x10c   : > { %v902_v20 = vmul.f32 %v722_v19, %v302_v14  ;;  %v903_v21 = vmul.f32 %v722_v19, %v303_v15 }
 0x10d   : > { %1055 = vst [vmem:[%s1287_s22 + $0x410] sm:$0xff] %v904_v17  ;;  %1056 = vst.msk [vmem:[%s1287_s22 + $0x418] sm:$0xff] %vm925_vm0, %v905_v18 }
 0x10e   : > { %1053 = vst [vmem:[%s1287_s22 + $0x400] sm:$0xff] %v902_v20  ;;  %1054 = vst.msk [vmem:[%s1287_s22 + $0x408] sm:$0xff] %vm925_vm0, %v903_v21  ;;  %v737_v26 = vpop.permute.xlu1 %736 }
 0x10f   : > { %v908_v27 = vmul.f32 %v737_v26, %v308_v22  ;;  %v909_v28 = vmul.f32 %v737_v26, %v309_v23  ;;  %v732_v29 = vpop.permute.xlu0 %731 }
 0x110   : > { %v906_v30 = vmul.f32 %v732_v29, %v306_v24  ;;  %v907_v31 = vmul.f32 %v732_v29, %v307_v25 }
 0x111   : > { %1059 = vst [vmem:[%s1287_s22 + $0x430] sm:$0xff] %v908_v27  ;;  %1060 = vst.msk [vmem:[%s1287_s22 + $0x438] sm:$0xff] %vm925_vm0, %v909_v28 }
 0x112   : > { %1057 = vst [vmem:[%s1287_s22 + $0x420] sm:$0xff] %v906_v30  ;;  %1058 = vst.msk [vmem:[%s1287_s22 + $0x428] sm:$0xff] %vm925_vm0, %v907_v31  ;;  %v747_v36 = vpop.permute.xlu1 %746 }
 0x113   : > { %v912_v37 = vmul.f32 %v747_v36, %v312_v32  ;;  %v913_v38 = vmul.f32 %v747_v36, %v313_v33  ;;  %v742_v39 = vpop.permute.xlu0 %741 }
 0x114   : > { %v910_v40 = vmul.f32 %v742_v39, %v310_v34  ;;  %v911_v41 = vmul.f32 %v742_v39, %v311_v35 }
 0x115   : > { %1063 = vst [vmem:[%s1287_s22 + $0x450] sm:$0xff] %v912_v37  ;;  %1064 = vst.msk [vmem:[%s1287_s22 + $0x458] sm:$0xff] %vm925_vm0, %v913_v38 }
 0x116   : > { %1061 = vst [vmem:[%s1287_s22 + $0x440] sm:$0xff] %v910_v40  ;;  %1062 = vst.msk [vmem:[%s1287_s22 + $0x448] sm:$0xff] %vm925_vm0, %v911_v41  ;;  %v757_v46 = vpop.permute.xlu1 %756 }
 0x117   : > { %v916_v47 = vmul.f32 %v757_v46, %v316_v42  ;;  %v917_v48 = vmul.f32 %v757_v46, %v317_v43  ;;  %v752_v49 = vpop.permute.xlu0 %751 }
 0x118   : > { %v914_v50 = vmul.f32 %v752_v49, %v314_v44  ;;  %v915_v51 = vmul.f32 %v752_v49, %v315_v45 }
 0x119   : > { %1067 = vst [vmem:[%s1287_s22 + $0x470] sm:$0xff] %v916_v47  ;;  %1068 = vst.msk [vmem:[%s1287_s22 + $0x478] sm:$0xff] %vm925_vm0, %v917_v48 }
 0x11a   : > { %1065 = vst [vmem:[%s1287_s22 + $0x460] sm:$0xff] %v914_v50  ;;  %1066 = vst.msk [vmem:[%s1287_s22 + $0x468] sm:$0xff] %vm925_vm0, %v915_v51  ;;  %v767_v56 = vpop.permute.xlu1 %766 }
 0x11b   : > { %v920_v57 = vmul.f32 %v767_v56, %v320_v52  ;;  %v921_v58 = vmul.f32 %v767_v56, %v321_v53  ;;  %v762_v59 = vpop.permute.xlu0 %761 }
 0x11c   : > { %v918_v60 = vmul.f32 %v762_v59, %v318_v54  ;;  %v919_v61 = vmul.f32 %v762_v59, %v319_v55 }
 0x11d   : > { %1071 = vst [vmem:[%s1287_s22 + $0x490] sm:$0xff] %v920_v57  ;;  %1072 = vst.msk [vmem:[%s1287_s22 + $0x498] sm:$0xff] %vm925_vm0, %v921_v58 }
 0x11e   : > { %1069 = vst [vmem:[%s1287_s22 + $0x480] sm:$0xff] %v918_v60  ;;  %1070 = vst.msk [vmem:[%s1287_s22 + $0x488] sm:$0xff] %vm925_vm0, %v919_v61 }
 0x11f   : > { %v772_v0 = vpop.permute.xlu0 %771 }
 0x120   : > { %v922_v1 = vmul.f32 %v772_v0, %v322_v62  ;;  %v923_v2 = vmul.f32 %v772_v0, %v323_v63 }
 0x122   : > { %1073 = vst [vmem:[%s1287_s22 + $0x4a0] sm:$0xff] %v922_v1  ;;  %1074 = vst.msk [vmem:[%s1287_s22 + $0x4a8] sm:$0xff] %vm925_vm0, %v923_v2 }
 0x123 PF: > { %s12_s9 = sadd.s32 1, %s1176_s9  }
 0x124   : > { %p9_p4 = scmp.ge.s32.totalorder %s12_s9, 4  }
 0x126   :  { %11 = sbr.rel (!%p9_p4) target bundleno = 1 (0x1), region = 61 }

</bundles_post_ra>
